<compile_context>
chip_gen: v6e
topology: v6e:2x2x1
jax: 0.10.0
libtpu: 0.0.40
codegen_flags: <defaults>
</compile_context>

<pallas_src>
import jax
import jax.numpy as jnp
from jax.experimental import pallas as pl
from jax.experimental.pallas import tpu as pltpu

nChannel = 32
OUT_FEATURES = 138
TB_TARGET = 1024             # batch-tile rows per grid step (multiple of 8)
SMALL_BATCH_FALLBACK = 1024  # below this many rows, plain XLA wins


def _round_up(x, m):
    return (x + m - 1) // m * m


def linear_kernel(z_ref, w_ref, b_ref, o_ref):
    # z_ref: (TB, nChannel), w_ref: (nChannel, OUT_FEATURES),
    # b_ref: (1, OUT_FEATURES), o_ref: (TB, OUT_FEATURES)
    acc = jnp.dot(z_ref[...], w_ref[...], preferred_element_type=jnp.float32)
    o_ref[...] = (acc + b_ref[...].astype(jnp.float32)).astype(o_ref.dtype)


def prepare_params(w, b, dtype=jnp.float32):
    """Hoisted out of the hot path: transpose nn.Linear weight once."""
    w_t = jnp.transpose(w).astype(dtype)            # (nChannel, OUT_FEATURES)
    b2 = b.astype(dtype).reshape(1, OUT_FEATURES)   # (1, OUT_FEATURES)
    return w_t, b2


def one_layer_forward(z, w_t, b2, *, use_pallas=None):
    """z: (B, nChannel); w_t: (nChannel, OUT_FEATURES); b2: (1, OUT_FEATURES)."""
    B = z.shape[0]
    if use_pallas is None:
        use_pallas = B >= SMALL_BATCH_FALLBACK
    if not use_pallas:
        # Small-batch fallback: launch overhead dwarfs an 8-row matmul.
        return z @ w_t + b2

    # Pick TB: as large as TB_TARGET, but aim for >= 2 grid steps so both
    # TensorCores on v7x get work; keep it a multiple of 8 for the (8,128) rule.
    half = -(-B // 2)
    TB = max(8, min(TB_TARGET, _round_up(half, 8)))
    grid = (pl.cdiv(B, TB),)   # ragged last block handled by Pallas, no jnp.pad

    return pl.pallas_call(
        linear_kernel,
        out_shape=jax.ShapeDtypeStruct((B, OUT_FEATURES), z.dtype),
        grid_spec=pltpu.PrefetchScalarGridSpec(
            num_scalar_prefetch=0,
            grid=grid,
            in_specs=[
                pl.BlockSpec((TB, nChannel), lambda i: (i, 0)),            # batch-tiled
                pl.BlockSpec((nChannel, OUT_FEATURES), lambda i: (0, 0)),  # VMEM-resident
                pl.BlockSpec((1, OUT_FEATURES), lambda i: (0, 0)),         # VMEM-resident
            ],
            out_specs=pl.BlockSpec((TB, OUT_FEATURES), lambda i: (i, 0)),
        ),
        compiler_params=pltpu.CompilerParams(
            dimension_semantics=("parallel",),   # shard batch tiles across TCs (v7x)
        ),
    )(z, w_t, b2)


if __name__ == "__main__":
    key = jax.random.PRNGKey(0)
    k_z, k_w, k_b, k_z2 = jax.random.split(key, 4)

    # Deterministic params mimicking PyTorch nn.Linear default init:
    # uniform(-1/sqrt(fan_in), 1/sqrt(fan_in))
    bound = 1.0 / (nChannel ** 0.5)
    w = jax.random.uniform(k_w, (OUT_FEATURES, nChannel),
                           minval=-bound, maxval=bound, dtype=jnp.float32)
    b = jax.random.uniform(k_b, (OUT_FEATURES,),
                           minval=-bound, maxval=bound, dtype=jnp.float32)
    w_t, b2 = prepare_params(w, b)

    # Small demo batch: force the Pallas path so the kernel is exercised.
    B = 8
    z = jax.random.normal(k_z, (B, nChannel), dtype=jnp.float32)
    out = one_layer_forward(z, w_t, b2, use_pallas=True)
    out = jax.block_until_ready(out)
    ref = z @ w.T + b[None, :]
    assert out.shape == (B, OUT_FEATURES)
    assert jnp.allclose(out, ref, atol=1e-4, rtol=1e-4)

    # Ragged-batch check (B not a multiple of TB): exercises the partial tile.
    B2 = 24
    z2 = jax.random.normal(k_z2, (B2, nChannel), dtype=jnp.float32)
    out2 = jax.block_until_ready(one_layer_forward(z2, w_t, b2, use_pallas=True))
    ref2 = z2 @ w.T + b[None, :]
    assert out2.shape == (B2, OUT_FEATURES)
    assert jnp.allclose(out2, ref2, atol=1e-4, rtol=1e-4)

    print("KERNEL_OK")
</pallas_src>

<mosaic_0001>
module attributes {stable_mosaic.version = 11 : i64} {
  func.func @linear_kernel(%arg0: i32, %arg1: memref<8x32xf32, #tpu.memory_space<vmem>>, %arg2: memref<32x138xf32, #tpu.memory_space<vmem>>, %arg3: memref<1x138xf32, #tpu.memory_space<vmem>>, %arg4: memref<8x138xf32, #tpu.memory_space<vmem>>) attributes {dimension_semantics = [#tpu.dimension_semantics<parallel>], iteration_bounds = array<i64: 1>, scalar_prefetch = 0 : i64, scratch_operands = 0 : i64, tpu.core_type = #tpu.core_type<tc>, window_params = [{transform_indices = @transform_0, window_bounds = array<i64: 8, 32>}, {pipeline_mode = #tpu.pipeline_mode<synchronous>, transform_indices = @transform_1, window_bounds = array<i64: 32, 138>}, {pipeline_mode = #tpu.pipeline_mode<synchronous>, transform_indices = @transform_2, window_bounds = array<i64: 1, 138>}, {transform_indices = @transform_3, window_bounds = array<i64: 8, 138>}]} {
    %c0 = arith.constant 0 : index
    %c0_0 = arith.constant 0 : index
    %0 = vector.load %arg1[%c0, %c0_0] : memref<8x32xf32, #tpu.memory_space<vmem>>, vector<8x32xf32>
    %c0_1 = arith.constant 0 : index
    %c0_2 = arith.constant 0 : index
    %1 = vector.load %arg2[%c0_1, %c0_2] : memref<32x138xf32, #tpu.memory_space<vmem>>, vector<32x138xf32>
    %cst = arith.constant dense<0.000000e+00> : vector<8x138xf32>
    %2 = tpu.matmul %0, %1, %cst {dimension_numbers = #tpu.dot_dimension_numbers<[1], [0], [0], [1], [0, 0, 1, 1], [], []>} : vector<8x32xf32>, vector<32x138xf32>, vector<8x138xf32> -> vector<8x138xf32>
    %c0_3 = arith.constant 0 : index
    %c0_4 = arith.constant 0 : index
    %3 = vector.load %arg3[%c0_3, %c0_4] : memref<1x138xf32, #tpu.memory_space<vmem>>, vector<1x138xf32>
    %4 = vector.broadcast %3 : vector<1x138xf32> to vector<8x138xf32>
    %5 = arith.addf %2, %4 : vector<8x138xf32>
    %c0_5 = arith.constant 0 : index
    %c0_6 = arith.constant 0 : index
    %6 = vector.load %arg4[%c0_5, %c0_6] : memref<8x138xf32, #tpu.memory_space<vmem>>, vector<8x138xf32>
    tpu.vector_store %arg4[%c0_5, %c0_6], %5 {strides = array<i32>} : memref<8x138xf32, #tpu.memory_space<vmem>>, vector<8x138xf32>,
    return
  }
  func.func @transform_0(%arg0: i32) -> (i32, i32) {
    %c0_i32 = arith.constant 0 : i32
    %c0_i32_0 = arith.constant 0 : i32
    return %arg0, %c0_i32 : i32, i32
  }
  func.func @transform_1(%arg0: i32) -> (i32, i32) {
    %c0_i32 = arith.constant 0 : i32
    %c0_i32_0 = arith.constant 0 : i32
    %c0_i32_1 = arith.constant 0 : i32
    return %c0_i32, %c0_i32_0 : i32, i32
  }
  func.func @transform_2(%arg0: i32) -> (i32, i32) {
    %c0_i32 = arith.constant 0 : i32
    %c0_i32_0 = arith.constant 0 : i32
    %c0_i32_1 = arith.constant 0 : i32
    return %c0_i32, %c0_i32_0 : i32, i32
  }
  func.func @transform_3(%arg0: i32) -> (i32, i32) {
    %c0_i32 = arith.constant 0 : i32
    %c0_i32_0 = arith.constant 0 : i32
    return %arg0, %c0_i32 : i32, i32
  }
}

</mosaic_0001>

<bundles_post_ra>
// kernel: tpu_custom_call.1
= control target key start
LH: loop header
LB: loop body
LE: loop exit
PB: predicated region body
PF: predicated region fallthrough
CT: control target
= control target key end

     0   :  { %8 = vsyncpa [#allocation3], 0  ;;  %s267_s0 = inlined_call_operand.hbm [shape: f32[8,32], index: 0, kind: input, shape index: {}]   ;;  %s268_s1 = inlined_call_operand.hbm [shape: f32[32,138], index: 1, kind: input, shape index: {}]   ;;  %s269_s2 = inlined_call_operand.vmem [shape: f32[1,138], index: 2, kind: input, shape index: {}]   ;;  %s270_s3 = inlined_call_operand.hbm [shape: f32[8,138], index: 3, kind: output, shape index: {}]  }
   0x1   :  { %9 = vsyncpa [#allocation6], 0 }
   0x2   :  { %10 = vsyncpa [#allocation4], 0  ;;  %s229_s12 = smov [#allocation2]   ;;  %s230_s14 = smov [#allocation5]  }
   0x3   :  { %s17_s13 = sshll.u32 %s229_s12, 4  ;;  %s26_s15 = sshll.u32 %s230_s14, 4  ;;  %s18_s13 = int_to_ptr.vmem [resolvable:$true] %s17_s13  ;;  %s27_s15 = int_to_ptr.vmem [resolvable:$true] %s26_s15 }
   0x4   :  { %s171_s16 = scalar_lea.vmem %s18_s13, 128  ;;  %p176_p1 = scmp.lt.s32.totalorder %s18_s13, %s18_s13 }
   0x5   :  { %p172_p0 = scmp.ne.s32.totalorder %s18_s13, %s171_s16  ;;  %p177_p2 = scmp.lt.s32.totalorder %s171_s16, %s171_s16 }
   0x7   :  { %p178_p3 = por %p177_p2, %p176_p1 }
   0x9   :  { %p179_p4 = pnand %p178_p3, %p172_p0 }
   0xb   :  { %182 = shalt.err (!%p179_p4)
}
   0xc   :  { %20 = dma.hbm_to_vmem [thread:$0]  %s267_s0, 128, %s18_s13, [#allocation3]  }
   0xd   :  { %s191_s19 = scalar_lea.vmem %s27_s15, 1024  ;;  %p196_p6 = scmp.lt.s32.totalorder %s27_s15, %s27_s15 }
   0xe   :  { %p192_p5 = scmp.ne.s32.totalorder %s27_s15, %s191_s19  ;;  %p197_p7 = scmp.lt.s32.totalorder %s191_s19, %s191_s19 }
  0x10   :  { %p198_p8 = por %p197_p7, %p196_p6 }
  0x12   :  { %p199_p9 = pnand %p198_p8, %p192_p5 }
  0x14   :  { %202 = shalt.err (!%p199_p9)
}
  0x15   :  { %s231_s20 = smov 256   ;;  %s232_s21 = smov 16  }
  0x16   :  { %32 = dma.hbm_to_vmem [thread:$0]  %s268_s1, 1024, %s27_s15, [#allocation6], %s231_s20, %s231_s20, %s232_s21  }
  0x17   :  { %223 = dma.done.wait [#allocation3], 128  }
  0x18   :  { %224 = vsyncadd [#allocation3], 4294967168 }
  0x19   :  { %225 = dma.done.wait [#allocation6], 1024  }
  0x1a   :  { %226 = vsyncadd [#allocation6], 4294966272  ;;  %v233_v0 = vmov 0.0   ;;  %v49_v1 = vld [vmem:[#allocation5 + $0x38] sm:$0xff]  ;;  %v48_v2 = vld [vmem:[#allocation5 + $0x30] sm:$0xff]  ;;  %vm62_vm0 = vcmask 261120   ;;  %v52_v10 = vlaneseq }
  0x1b   :  { %130 = vmatprep.mubr.f32.mxu0 %v233_v0  ;;  %v47_v3 = vld [vmem:[#allocation5 + $0x28] sm:$0xff]  ;;  %90 = vmatprep.subr.mxu0 %v49_v1  ;;  %v46_v4 = vld [vmem:[#allocation5 + $0x20] sm:$0xff]  ;;  %v45_v5 = vld [vmem:[#allocation5 + $0x18] sm:$0xff]  ;;  %s234_s24 = smov [#allocation7]   ;;  %vm138_vm1 = vcmask 80896  }
  0x1c   :  { %91 = vmatpush1.msra.mxu0 %v48_v2  ;;  %v44_v6 = vld [vmem:[#allocation5 + $0x10] sm:$0xff]  ;;  %v43_v7 = vld [vmem:[#allocation5 + $0x8] sm:$0xff]  ;;  %v42_v8 = vld [vmem:[#allocation5] sm:$0xff]  ;;  %v53_v11 = vshrl.u32 %v52_v10, 7  ;;  %s146_s25 = sshll.u32 %s234_s24, 4  ;;  %s147_s25 = int_to_ptr.vmem [resolvable:$true] %s146_s25 }
  0x1d   :  { %92 = vmatprep.subr.mxu0 %v47_v3  ;;  %v41_v9 = vld [vmem:[#allocation2] sm:$0xff]  ;;  %s203_s26 = scalar_lea.vmem %s147_s25, 256  ;;  %p208_p11 = scmp.lt.s32.totalorder %s147_s25, %s147_s25 }
  0x1e   :  { %93 = vmatpush1.msra.mxu0 %v46_v4  ;;  %v54_v12 = vsub.s32 0, %v53_v11  ;;  %v50_v13 = vld [vmem:[%s269_s2] sm:$0x3]  ;;  %v58_v14 = vsub.s32 1, %v53_v11  ;;  %p204_p10 = scmp.ne.s32.totalorder %s147_s25, %s203_s26  ;;  %p209_p12 = scmp.lt.s32.totalorder %s203_s26, %s203_s26 }
  0x1f   :  { %94 = vmatprep.subr.mxu0 %v45_v5 }
  0x20   :  { %95 = vmatpush1.msra.mxu0 %v44_v6  ;;  %v55_v15 = vrot.slane %v50_v13, %v54_v12  ;;  %v59_v16 = vrot.slane %v50_v13, %v58_v14  ;;  %p210_p13 = por %p209_p12, %p208_p11 }
  0x21   :  { %96 = vmatprep.subr.mxu0 %v43_v7 }
  0x22   :  { %97 = vmatpush1.msra.mxu0 %v42_v8  ;;  %p211_p0 = pnand %p210_p13, %p204_p10 }
  0x23   :  { %156 = vmatmul.mubr.msk.f32.vlgmr.msra.gmra.mxu0 %vm62_vm0, %v41_v9 }
  0xe3   :  { %v132_v17 = vpop.f32.mrf.mxu0 }
  0xe4   :  { %v133_v18 = vadd.f32 %v132_v17, %v55_v15 }
  0xe5   :  { %v134_v19 = vpop.f32.mrf.mxu0 }
  0xe6   :  { %137 = vst [vmem:[#allocation7] sm:$0xff] %v133_v18  ;;  %v135_v20 = vadd.f32 %v134_v19, %v59_v16 }
  0xe8   :  { %139 = vst.msk [vmem:[#allocation7 + $0x8] sm:$0xff] %vm138_vm1, %v135_v20 }
  0xe9   :  { %214 = shalt.err (!%p211_p0)
}
  0xea   :  { %149 = dma.vmem_to_hbm [thread:$0]  %s147_s25, 256, %s270_s3, [#allocation4]  }
  0xeb   :  { %227 = dma.done.wait [#allocation4], 256  }
  0xec   :  { %228 = vsyncadd [#allocation4], 4294967040 }
  0xed   :  { %153 = vsyncpa [#allocation3], 1 }
  0xee   :  { %154 = vsyncpa [#allocation6], 1 }
  0xef   :  { %155 = vsyncpa [#allocation4], 1 }

</bundles_post_ra>
